<compile_context>
chip_gen: v6e
topology: v6e:2x2x1
jax: 0.10.0
libtpu: 0.0.40
codegen_flags: <defaults>
</compile_context>

<pallas_src>
import jax
import jax.numpy as jnp
from jax import lax
from jax.experimental import pallas as pl
from jax.experimental.pallas import tpu as pltpu

# Layer dims: 1 -> 10 -> 18 -> 15 -> 4 -> 1
DIMS = [1, 10, 18, 15, 4, 1]

# 8-aligned row offsets of each layer's [W | b] block inside the packed slab.
_L1, _L2, _L3, _L4, _L5 = 0, 16, 40, 56, 64
P_ROWS, P_COLS = 72, 19          # slab shape (widest layer: 18 weight cols + 1 bias col)

_CHUNK = 512                     # register-resident lanes per inner compute step


# ----------------------------------------------------------------------------
# Pallas kernel: fused MLP forward in (features, batch) layout
# ----------------------------------------------------------------------------
def mlp_kernel(p_ref, x_ref, o_ref):
    # Hoist all parameter slices above the chunk loop (loaded once per grid step).
    w1 = p_ref[_L1:_L1 + 10, 0:1]          # (10, 1)
    b1 = p_ref[_L1:_L1 + 10, 1:2]          # (10, 1)
    w2 = p_ref[_L2:_L2 + 18, 0:10]         # (18, 10)
    b2 = p_ref[_L2:_L2 + 18, 10:11]        # (18, 1)
    w3 = p_ref[_L3:_L3 + 15, 0:18]         # (15, 18)
    b3 = p_ref[_L3:_L3 + 15, 18:19]        # (15, 1)
    w4 = p_ref[_L4:_L4 + 4, 0:15]          # (4, 15)
    b4 = p_ref[_L4:_L4 + 4, 15:16]         # (4, 1)
    w5 = p_ref[_L5:_L5 + 1, 0:4]           # (1, 4)  stored as a row -> MXU dot
    b5 = p_ref[_L5:_L5 + 1, 4:5]           # (1, 1)

    tn = x_ref.shape[-1]                               # static block width
    chunk = _CHUNK if tn % _CHUNK == 0 else tn         # wrapper guarantees divisibility
    n_chunks = tn // chunk

    def body(j, carry):
        c0 = pl.multiple_of(j * chunk, 128)
        x = x_ref[:, pl.ds(c0, chunk)]                 # (1, chunk), batch on lanes

        # Layer 1 (1 -> 10): K == 1 -> VPU broadcast outer product, no MXU.
        h = jnp.maximum(w1 * x + b1, 0.0)              # (10, chunk)

        # Layers 2-4: MXU matmuls W @ h with f32 accumulation.
        h = jnp.maximum(jnp.dot(w2, h, preferred_element_type=jnp.float32) + b2, 0.0)
        h = jnp.maximum(jnp.dot(w3, h, preferred_element_type=jnp.float32) + b3, 0.0)
        h = jnp.maximum(jnp.dot(w4, h, preferred_element_type=jnp.float32) + b4, 0.0)

        # Layer 5 (4 -> 1): MXU dot (the MXU slot has slack; VALU/XLU do not).
        o = jnp.dot(w5, h, preferred_element_type=jnp.float32) + b5     # (1, chunk)
        o_ref[:, pl.ds(c0, chunk)] = o.astype(o_ref.dtype)
        return carry

    lax.fori_loop(0, n_chunks, body, 0, unroll=False)


# ----------------------------------------------------------------------------
# Parameter packing: all weights/biases -> one (72, 19) f32 slab
# ----------------------------------------------------------------------------
def pack_params(params):
    """params: list of (W, b) with W: (out, in) (PyTorch layout), b: (out,)."""
    slab = jnp.zeros((P_ROWS, P_COLS), jnp.float32)
    for (w, b), r in zip(params[:4], (_L1, _L2, _L3, _L4)):
        out_d, in_d = w.shape
        slab = slab.at[r:r + out_d, 0:in_d].set(w)
        slab = slab.at[r:r + out_d, in_d].set(b)
    w5, b5 = params[4]                                  # w5: (1, 4), b5: (1,)
    slab = slab.at[_L5:_L5 + 1, 0:4].set(w5)            # store W5 as a row
    slab = slab.at[_L5, 4].set(b5[0])
    return slab


# ----------------------------------------------------------------------------
# Wrapper: (N, 1) in / (N, 1) out, batch tiled onto the lane axis
# ----------------------------------------------------------------------------
def _round_up(a, b):
    return ((a + b - 1) // b) * b


def module_2_forward(x, params, *, max_tile=8192):
    n = x.shape[0]
    slab = pack_params(params)

    # (N, 1) -> (1, N): pure metadata reshape, no extra HBM pass.
    xt = x.reshape(1, n)

    # Lane tile: multiple of 128; once >= 512 also a multiple of the in-kernel
    # chunk so the chunk loop has a static, even trip count.  Ragged last grid
    # block (and n < tn) is handled by Pallas block padding; padded-lane writes
    # are discarded, so no host-side pad/slice is needed.
    max_tile = max(_CHUNK, _round_up(max_tile, _CHUNK))
    n_up = _round_up(n, 128)
    tn = n_up if n_up < _CHUNK else min(max_tile, _round_up(n_up, _CHUNK))
    assert tn % 128 == 0 and (tn < _CHUNK or tn % _CHUNK == 0)
    grid = (pl.cdiv(n, tn),)

    flops = 2 * n_up * sum(a * b for a, b in zip(DIMS[:-1], DIMS[1:]))
    cost = pl.CostEstimate(
        flops=flops,
        transcendentals=0,
        bytes_accessed=8 * n_up + 4 * P_ROWS * P_COLS,
    )

    out_t = pl.pallas_call(
        mlp_kernel,
        out_shape=jax.ShapeDtypeStruct((1, n), jnp.float32),
        grid=grid,
        in_specs=[
            pl.BlockSpec((P_ROWS, P_COLS), lambda i: (0, 0)),   # params: resident slab
            pl.BlockSpec((1, tn), lambda i: (0, i)),            # x batch tile
        ],
        out_specs=pl.BlockSpec((1, tn), lambda i: (0, i)),
        compiler_params=pltpu.CompilerParams(
            dimension_semantics=("parallel",),
            vmem_limit_bytes=48 * 1024 * 1024,                  # safe on v5e/v6e/v7x
        ),
        cost_estimate=cost,
    )(slab, xt)

    return out_t.reshape(n, 1)                                  # back to (N, 1)


# ----------------------------------------------------------------------------
# Deterministic parameter init (PyTorch nn.Linear default: U(-1/sqrt(fan_in), +))
# ----------------------------------------------------------------------------
def init_params(key):
    params = []
    for i in range(len(DIMS) - 1):
        fan_in, fan_out = DIMS[i], DIMS[i + 1]
        key, kw, kb = jax.random.split(key, 3)
        bound = 1.0 / (fan_in ** 0.5)
        w = jax.random.uniform(kw, (fan_out, fan_in), jnp.float32, -bound, bound)
        b = jax.random.uniform(kb, (fan_out,), jnp.float32, -bound, bound)
        params.append((w, b))
    return params


# ----------------------------------------------------------------------------
# Pure-JAX reference (PyTorch semantics: x @ W.T + b, ReLU between layers)
# ----------------------------------------------------------------------------
def reference_forward(x, params):
    h = x
    for i, (w, b) in enumerate(params):
        h = h @ w.T + b
        if i < len(params) - 1:
            h = jnp.maximum(h, 0.0)
    return h


if __name__ == "__main__":
    key = jax.random.PRNGKey(0)
    key_x1, key_x2, key_p = jax.random.split(key, 3)
    params = init_params(key_p)

    # Small batch of scalar inputs, matching Linear(1, 10) expecting (N, 1).
    N1 = 8
    x1 = jax.random.normal(key_x1, (N1, 1), dtype=jnp.float32)
    out1 = jax.block_until_ready(module_2_forward(x1, params))
    ref1 = reference_forward(x1, params)
    assert out1.shape == (N1, 1), out1.shape
    assert jnp.allclose(out1, ref1, atol=1e-5, rtol=1e-5)

    # Exercise multi-grid-step + multi-chunk + ragged last block paths.
    N2 = 1000
    x2 = jax.random.normal(key_x2, (N2, 1), dtype=jnp.float32)
    out2 = jax.block_until_ready(module_2_forward(x2, params, max_tile=512))
    ref2 = reference_forward(x2, params)
    assert out2.shape == (N2, 1), out2.shape
    assert jnp.allclose(out2, ref2, atol=1e-5, rtol=1e-5)

    print("KERNEL_OK")
</pallas_src>

<mosaic_0001>
module attributes {stable_mosaic.version = 11 : i64} {
  func.func @mlp_kernel(%arg0: i32, %arg1: memref<72x19xf32, #tpu.memory_space<vmem>>, %arg2: memref<1x128xf32, #tpu.memory_space<vmem>>, %arg3: memref<1x128xf32, #tpu.memory_space<vmem>>) attributes {dimension_semantics = [#tpu.dimension_semantics<parallel>], iteration_bounds = array<i64: 1>, scalar_prefetch = 0 : i64, scratch_operands = 0 : i64, tpu.core_type = #tpu.core_type<tc>, window_params = [{pipeline_mode = #tpu.pipeline_mode<synchronous>, transform_indices = @transform_0, window_bounds = array<i64: 72, 19>}, {transform_indices = @transform_1, window_bounds = array<i64: 1, 128>}, {transform_indices = @transform_2, window_bounds = array<i64: 1, 128>}]} {
    %c0 = arith.constant 0 : index
    %c0_0 = arith.constant 0 : index
    %0 = vector.load %arg1[%c0, %c0_0] : memref<72x19xf32, #tpu.memory_space<vmem>>, vector<10x1xf32>
    %c0_1 = arith.constant 0 : index
    %c1 = arith.constant 1 : index
    %1 = vector.load %arg1[%c0_1, %c1] : memref<72x19xf32, #tpu.memory_space<vmem>>, vector<10x1xf32>
    %c16 = arith.constant 16 : index
    %c0_2 = arith.constant 0 : index
    %2 = vector.load %arg1[%c16, %c0_2] : memref<72x19xf32, #tpu.memory_space<vmem>>, vector<18x10xf32>
    %c16_3 = arith.constant 16 : index
    %c10 = arith.constant 10 : index
    %3 = vector.load %arg1[%c16_3, %c10] : memref<72x19xf32, #tpu.memory_space<vmem>>, vector<18x1xf32>
    %c40 = arith.constant 40 : index
    %c0_4 = arith.constant 0 : index
    %4 = vector.load %arg1[%c40, %c0_4] : memref<72x19xf32, #tpu.memory_space<vmem>>, vector<15x18xf32>
    %c40_5 = arith.constant 40 : index
    %c18 = arith.constant 18 : index
    %5 = vector.load %arg1[%c40_5, %c18] : memref<72x19xf32, #tpu.memory_space<vmem>>, vector<15x1xf32>
    %c56 = arith.constant 56 : index
    %c0_6 = arith.constant 0 : index
    %6 = vector.load %arg1[%c56, %c0_6] : memref<72x19xf32, #tpu.memory_space<vmem>>, vector<4x15xf32>
    %c56_7 = arith.constant 56 : index
    %c15 = arith.constant 15 : index
    %7 = vector.load %arg1[%c56_7, %c15] : memref<72x19xf32, #tpu.memory_space<vmem>>, vector<4x1xf32>
    %c64 = arith.constant 64 : index
    %c0_8 = arith.constant 0 : index
    %8 = vector.load %arg1[%c64, %c0_8] : memref<72x19xf32, #tpu.memory_space<vmem>>, vector<1x4xf32>
    %c64_9 = arith.constant 64 : index
    %c4 = arith.constant 4 : index
    %9 = vector.load %arg1[%c64_9, %c4] : memref<72x19xf32, #tpu.memory_space<vmem>>, vector<1x1xf32>
    %c0_i32 = arith.constant 0 : i32
    %c128_i32 = arith.constant 128 : i32
    %10 = arith.muli %c0_i32, %c128_i32 : i32
    %11 = tpu.assume_multiple %10, 128 : i32
    %c0_10 = arith.constant 0 : index
    %12 = arith.index_cast %11 : i32 to index
    %13 = vector.load %arg2[%c0_10, %12] : memref<1x128xf32, #tpu.memory_space<vmem>>, vector<1x128xf32>
    %14 = vector.broadcast %0 : vector<10x1xf32> to vector<10x128xf32>
    %15 = vector.broadcast %13 : vector<1x128xf32> to vector<10x128xf32>
    %16 = arith.mulf %14, %15 : vector<10x128xf32>
    %17 = vector.broadcast %1 : vector<10x1xf32> to vector<10x128xf32>
    %18 = arith.addf %16, %17 : vector<10x128xf32>
    %cst = arith.constant 0.000000e+00 : f32
    %19 = vector.broadcast %cst : f32 to vector<10x128xf32>
    %20 = arith.maximumf %18, %19 : vector<10x128xf32>
    %cst_11 = arith.constant dense<0.000000e+00> : vector<18x128xf32>
    %21 = tpu.matmul %2, %20, %cst_11 {dimension_numbers = #tpu.dot_dimension_numbers<[1], [0], [0], [1], [0, 0, 1, 1], [], []>} : vector<18x10xf32>, vector<10x128xf32>, vector<18x128xf32> -> vector<18x128xf32>
    %22 = vector.broadcast %3 : vector<18x1xf32> to vector<18x128xf32>
    %23 = arith.addf %21, %22 : vector<18x128xf32>
    %cst_12 = arith.constant 0.000000e+00 : f32
    %24 = vector.broadcast %cst_12 : f32 to vector<18x128xf32>
    %25 = arith.maximumf %23, %24 : vector<18x128xf32>
    %cst_13 = arith.constant dense<0.000000e+00> : vector<15x128xf32>
    %26 = tpu.matmul %4, %25, %cst_13 {dimension_numbers = #tpu.dot_dimension_numbers<[1], [0], [0], [1], [0, 0, 1, 1], [], []>} : vector<15x18xf32>, vector<18x128xf32>, vector<15x128xf32> -> vector<15x128xf32>
    %27 = vector.broadcast %5 : vector<15x1xf32> to vector<15x128xf32>
    %28 = arith.addf %26, %27 : vector<15x128xf32>
    %cst_14 = arith.constant 0.000000e+00 : f32
    %29 = vector.broadcast %cst_14 : f32 to vector<15x128xf32>
    %30 = arith.maximumf %28, %29 : vector<15x128xf32>
    %cst_15 = arith.constant dense<0.000000e+00> : vector<4x128xf32>
    %31 = tpu.matmul %6, %30, %cst_15 {dimension_numbers = #tpu.dot_dimension_numbers<[1], [0], [0], [1], [0, 0, 1, 1], [], []>} : vector<4x15xf32>, vector<15x128xf32>, vector<4x128xf32> -> vector<4x128xf32>
    %32 = vector.broadcast %7 : vector<4x1xf32> to vector<4x128xf32>
    %33 = arith.addf %31, %32 : vector<4x128xf32>
    %cst_16 = arith.constant 0.000000e+00 : f32
    %34 = vector.broadcast %cst_16 : f32 to vector<4x128xf32>
    %35 = arith.maximumf %33, %34 : vector<4x128xf32>
    %cst_17 = arith.constant dense<0.000000e+00> : vector<1x128xf32>
    %36 = tpu.matmul %8, %35, %cst_17 {dimension_numbers = #tpu.dot_dimension_numbers<[1], [0], [0], [1], [0, 0, 1, 1], [], []>} : vector<1x4xf32>, vector<4x128xf32>, vector<1x128xf32> -> vector<1x128xf32>
    %37 = vector.broadcast %9 : vector<1x1xf32> to vector<1x128xf32>
    %38 = arith.addf %36, %37 : vector<1x128xf32>
    %c0_18 = arith.constant 0 : index
    %39 = arith.index_cast %11 : i32 to index
    %40 = vector.load %arg3[%c0_18, %39] : memref<1x128xf32, #tpu.memory_space<vmem>>, vector<1x128xf32>
    tpu.vector_store %arg3[%c0_18, %39], %38 {strides = array<i32>} : memref<1x128xf32, #tpu.memory_space<vmem>>, vector<1x128xf32>,
    %c1_i32 = arith.constant 1 : i32
    return
  }
  func.func @transform_0(%arg0: i32) -> (i32, i32) {
    %c0_i32 = arith.constant 0 : i32
    %c0_i32_0 = arith.constant 0 : i32
    %c0_i32_1 = arith.constant 0 : i32
    return %c0_i32, %c0_i32_0 : i32, i32
  }
  func.func @transform_1(%arg0: i32) -> (i32, i32) {
    %c0_i32 = arith.constant 0 : i32
    %c0_i32_0 = arith.constant 0 : i32
    return %c0_i32, %arg0 : i32, i32
  }
  func.func @transform_2(%arg0: i32) -> (i32, i32) {
    %c0_i32 = arith.constant 0 : i32
    %c0_i32_0 = arith.constant 0 : i32
    return %c0_i32, %arg0 : i32, i32
  }
}

</mosaic_0001>

<bundles_post_ra>
// kernel: tpu_custom_call.1
= control target key start
LH: loop header
LB: loop body
LE: loop exit
PB: predicated region body
PF: predicated region fallthrough
CT: control target
= control target key end

     0   :  { %v536_v1 = vmov 1   ;;  %v537_v2 = vmov 0   ;;  %s613_s0 = inlined_call_operand.vmem [shape: f32[72,19], index: 0, kind: input, shape index: {}]   ;;  %s614_s1 = inlined_call_operand.vmem [shape: f32[1,8], index: 1, kind: input, shape index: {}]   ;;  %s615_s2 = inlined_call_operand.hbm [shape: f32[1,8], index: 2, kind: output, shape index: {}]  }
   0x1   :  { %v13_v0 = vld [vmem:[%s613_s0 + $0x8] sm:$0x3]  ;;  %507 = vset.pattern.permute.xlu1 %v536_v1  ;;  %506 = vset.pattern.permute.xlu0 %v537_v2 }
   0x2   :  { %7 = vsyncpa [#allocation3], 0  ;;  %45 = vperm.xlu1 %507, %v13_v0   ;;  %29 = vperm.xlu0 %506, %v13_v0   ;;  %v12_v3 = vld [vmem:[%s613_s0] sm:$0xff]  ;;  %v538_v4 = vmov 0.0   ;;  %vm539_vm0 = vmmov 0   ;;  %v15_v5 = vld [vmem:[%s613_s0 + $0x18] sm:$0xff] }
   0x3   :  { %463 = vmatprep.subr.mxu0 %v538_v4  ;;  %467 = vmatprep.mubr.msk.f32.mxu0 %vm539_vm0, %v538_v4  ;;  %v16_v6 = vld [vmem:[%s613_s0 + $0x20] sm:$0x3]  ;;  %v540_v7 = vmov 10   ;;  %v14_v8 = vld [vmem:[%s613_s0 + $0x10] sm:$0xff]  ;;  %vm74_vm1 = vcmask 1041408   ;;  %vm67_vm2 = vcmask 80896  }
   0x4   :  { %v436_v9 = vld [vmem:[%s614_s1] ss:$0 sm:$0xff]  ;;  %v17_v20 = vld [vmem:[%s613_s0 + $0x28] sm:$0xff]  ;;  %vm171_vm3 = vcmask 146432   ;;  %v18_v21 = vld [vmem:[%s613_s0 + $0x30] sm:$0x7f] }
   0x5   :  { %482 = vmatprep.mubr.msk.f32.mxu1 %vm171_vm3, %v17_v20  ;;  %v541_v22 = vmov 18   ;;  %v19_v38 = vld [vmem:[%s613_s0 + $0x38] sm:$0xf]  ;;  %v542_v39 = vmov 15   ;;  %vm264_vm4 = vcmask 1046528   ;;  %vm261_vm5 = vcmask 121856  }
   0x6   :  { %41 = vperm.xlu1 %507, %v12_v3   ;;  %24 = vperm.xlu0 %506, %v12_v3   ;;  %v20_v48 = vld [vmem:[%s613_s0 + $0x40] sm:$0x1]  ;;  %v543_v49 = vmov 4   ;;  %vm347_vm6 = vcmask 1043456   ;;  %vm344_vm7 = vcmask 31744   ;;  %s544_s28 = smov [#allocation2]  }
   0x7   :  { %s428_s29 = sshll.u32 %s544_s28, 4  ;;  %s429_s29 = int_to_ptr.vmem [resolvable:$true] %s428_s29 }
   0x8   :  { %s514_s0 = scalar_lea.vmem %s429_s29, 16  ;;  %s518_s30 = scalar_lea.vmem %s429_s29, 32 }
   0x9   :  { %p515_p0 = scmp.ne.s32.totalorder %s429_s29, %s514_s0  ;;  %p519_p1 = scmp.lt.s32.totalorder %s429_s29, %s429_s29 }
   0xa   :  { %509 = vset.pattern.permute.xlu1 %v540_v7  ;;  %508 = vset.pattern.permute.xlu0 %v540_v7  ;;  %p520_p2 = scmp.lt.s32.totalorder %s518_s30, %s514_s0 }
   0xb   :  { %59 = vperm.xlu1 %509, %v15_v5   ;;  %64 = vperm.xlu0 %508, %v16_v6  }
   0xc   :  { %p521_p3 = por %p520_p2, %p519_p1 }
   0xe   :  { %p522_p4 = pnand %p521_p3, %p515_p0 }
   0xf   :  { %54 = vperm.xlu1 %509, %v14_v8   ;;  %510 = vset.pattern.permute.xlu0 %v541_v22 }
  0x10   :  { %168 = vperm.xlu0 %510, %v18_v21  }
  0x13   :  { %511 = vset.pattern.permute.xlu1 %v541_v22 }
  0x14   :  { %163 = vperm.xlu1 %511, %v17_v20   ;;  %513 = vset.pattern.permute.xlu0 %v543_v49 }
  0x15   :  { %341 = vperm.xlu0 %513, %v20_v48  }
  0x18   :  { %512 = vset.pattern.permute.xlu1 %v542_v39 }
  0x19   :  { %258 = vperm.xlu1 %512, %v19_v38  }
  0x7d   :  { %v46_v10 = vpop.permute.xlu1 %45  ;;  %v30_v11 = vpop.permute.xlu0 %29 }
  0x7e   :  { %v39_v12 = vmul.f32 %v436_v9, %v30_v11 }
  0x80   :  { %v49_v13 = vadd.f32 %v46_v10, %v39_v12 }
  0x81   :  { %v25_v14 = vpop.permute.xlu0 %24  ;;  %v42_v17 = vpop.permute.xlu1 %41 }
  0x82   :  { %v51_v15 = vmax.f32 %v49_v13, 0.0  ;;  %v38_v16 = vmul.f32 %v436_v9, %v25_v14 }
  0x84   :  { %v48_v18 = vadd.f32 %v42_v17, %v38_v16  ;;  %464 = vmatpush3.msk.msra.mxu0 %vm74_vm1, %v51_v15 }
  0x85   :  { %465 = vmatprep.subr.mxu0 %v538_v4 }
  0x86   :  { %v50_v19 = vmax.f32 %v48_v18, 0.0  ;;  %v60_v24 = vpop.permute.xlu1 %59  ;;  %v65_v28 = vpop.permute.xlu0 %64 }
  0x88   :  { %466 = vmatpush3.msra.mxu0 %v50_v19 }
  0x89   :  { %468 = vmatmul.mubr.msk.f32.vlgmr.msra.gmra.mxu0 %vm67_vm2, %v14_v8 }
  0x8a   :  { %470 = vmatprep.mubr.msk.f32.mxu0 %vm539_vm0, %v538_v4  ;;  %v55_v29 = vpop.permute.xlu1 %54 }
  0x8b   :  { %v169_v40 = vpop.permute.xlu0 %168 }
  0x8d   :  { %471 = vmatmul.mubr.msk.f32.gmra.mxu0 %vm67_vm2, %v15_v5 }
  0x8e   :  { %473 = vmatprep.mubr.msk.f32.mxu0 %vm539_vm0, %v538_v4 }
  0x8f   :  { %v164_v42 = vpop.permute.xlu1 %163 }
  0x90   :  { %v342_v55 = vpop.permute.xlu0 %341 }
  0x91   :  { %474 = vmatmul.mubr.msk.f32.gmra.mxu0 %vm67_vm2, %v16_v6 }
  0x94   :  { %v259_v50 = vpop.permute.xlu1 %258 }
 0x149   :  { %v144_v23 = vpop.f32.mrf.mxu0 }
 0x14a   :  { %v145_v34 = vadd.f32 %v144_v23, %v55_v29 }
 0x14b   :  { %v469_v25 = vpop.f32.mrf.mxu0 }
 0x14c   :  { %v158_v37 = vmax.f32 %v145_v34, 0.0 }
 0x14d   :  { %v149_v26 = vpop.f32.mrf.mxu0 }
 0x14e   :  { %v150_v31 = vadd.f32 %v149_v26, %v60_v24 }
 0x14f   :  { %v472_v27 = vpop.f32.mrf.mxu0 }
 0x150   :  { %v159_v36 = vmax.f32 %v150_v31, 0.0 }
 0x151   :  { %v154_v30 = vpop.f32.mrf.mxu0 }
 0x152   :  { %v155_v32 = vadd.f32 %v154_v30, %v65_v28 }
 0x153   :  { %v475_v33 = vpop.f32.mrf.mxu0 }
 0x154   :  { %v160_v35 = vmax.f32 %v155_v32, 0.0 }
 0x156   :  { %476 = vmatprep.subr.msk.mxu1 %vm74_vm1, %v160_v35 }
 0x157   :  { %477 = vmatpush3.msk.msra.mxu1 %vm74_vm1, %v160_v35 }
 0x158   :  { %478 = vmatprep.subr.mxu1 %v159_v36 }
 0x159   :  { %479 = vmatpush3.msra.mxu1 %v159_v36 }
 0x15a   :  { %480 = vmatprep.subr.mxu1 %v158_v37 }
 0x15b   :  { %481 = vmatpush3.msra.mxu1 %v158_v37 }
 0x15c   :  { %483 = vmatmul.mubr.msk.f32.vlgmr.msra.gmra.mxu1 %vm171_vm3, %v18_v21  ;;  %485 = vmatprep.subr.mxu1 %v538_v4 }
 0x15d   :  { %489 = vmatprep.mubr.msk.f32.mxu1 %vm539_vm0, %v538_v4 }
 0x21c   :  { %v484_v41 = vpop.f32.mrf.mxu1 }
 0x21d   :  { %v251_v43 = vadd.f32 %v484_v41, %v169_v40 }
 0x21e   :  { %v245_v44 = vpop.f32.mrf.mxu1 }
 0x21f   :  { %v255_v45 = vmax.f32 %v251_v43, 0.0  ;;  %v246_v46 = vadd.f32 %v245_v44, %v164_v42 }
 0x221   :  { %v254_v47 = vmax.f32 %v246_v46, 0.0  ;;  %486 = vmatpush3.msk.msra.mxu1 %vm264_vm4, %v255_v45 }
 0x222   :  { %487 = vmatprep.subr.mxu1 %v538_v4 }
 0x223   :  { %488 = vmatpush3.msra.mxu1 %v254_v47 }
 0x224   :  { %490 = vmatmul.mubr.msk.f32.vlgmr.msra.gmra.mxu1 %vm261_vm5, %v19_v38  ;;  %492 = vmatprep.subr.mxu1 %v538_v4 }
 0x225   :  { %494 = vmatprep.mubr.msk.f32.mxu1 %vm539_vm0, %v538_v4 }
 0x2e4   :  { %v334_v51 = vpop.f32.mrf.mxu1 }
 0x2e5   :  { %v335_v52 = vadd.f32 %v334_v51, %v259_v50 }
 0x2e6   :  { %v491_v53 = vpop.f32.mrf.mxu1 }
 0x2e7   :  { %v338_v54 = vmax.f32 %v335_v52, 0.0 }
 0x2e9   :  { %493 = vmatpush3.msk.msra.mxu1 %vm347_vm6, %v338_v54 }
 0x2ea   :  { %495 = vmatmul.mubr.msk.f32.vlgmr.msra.gmra.mxu1 %vm344_vm7, %v20_v48 }
 0x3aa   :  { %v417_v56 = vpop.f32.mrf.mxu1 }
 0x3ab   :  { %v418_v57 = vadd.f32 %v417_v56, %v342_v55 }
 0x3ac   :  { %v496_v58 = vpop.f32.mrf.mxu1 }
 0x3ad   :  { %421 = vst [vmem:[#allocation2] sm:$0x1] %v418_v57 }
 0x3ae   :  { %525 = shalt.err (!%p522_p4)
}
 0x3af   :  { %431 = dma.vmem_to_hbm [thread:$0]  %s429_s29, 16, %s615_s2, [#allocation3]  }
 0x3b0   :  { %534 = dma.done.wait [#allocation3], 16  }
 0x3b1   :  { %535 = vsyncadd [#allocation3], 4294967280 }
 0x3b2   :  { %435 = vsyncpa [#allocation3], 1 }

</bundles_post_ra>
